<compile_context>
chip_gen: v7x
topology: tpu7x:2x2x1
jax: 0.10.0
libtpu: 0.0.40
codegen_flags: <defaults>
</compile_context>

<pallas_src>
import math
from functools import partial

import jax
import jax.numpy as jnp
from jax.experimental import pallas as pl
from jax.experimental.pallas import tpu as pltpu


def _tree_max_blocks(seg, nblk, m):
    """Max-reduce `nblk` consecutive width-`m` lane blocks of seg (..., nblk*m)
    down to (..., m) with a log-depth slice tree (few unaligned lane slices)."""
    leftover = None
    while nblk > 1:
        if nblk % 2:
            tail = seg[:, :, (nblk - 1) * m: nblk * m]
            leftover = tail if leftover is None else jnp.maximum(leftover, tail)
            nblk -= 1
        half = nblk // 2
        seg = jnp.maximum(seg[:, :, : half * m], seg[:, :, half * m: nblk * m])
        nblk = half
    return seg if leftover is None else jnp.maximum(seg, leftover)


def _make_kernel(B, T, m, Cin, c_blk, K, dil, hidP, use_pool):
    T_out = T - dil * (K - 1)
    L = T_out * m
    TM = T * m
    KC = K * Cin
    eps = 1e-5
    inv_n = 1.0 / float(B * T_out * m)

    def kernel(x_ref, p_ref, o_ref):
        # ---- hoisted loads ----------------------------------------------------
        x = x_ref[...]                       # (B, Cin, T*m): Cin on sublanes, time*regions on lanes
        P = p_ref[...]                       # (c_blk, K*Cin+2): [w cols | gamma | beta]
        gamma = P[:, KC:KC + 1]              # (c_blk, 1)
        beta = P[:, KC + 1:KC + 2]           # (c_blk, 1)

        # ---- nn.Conv2d(kernel_size=(K,1), dilation=(dil,1)) --------------------
        # Conv bias intentionally omitted: training-mode BN below subtracts the
        # batch mean, which cancels a per-channel bias exactly.
        # One sublane broadcast per input channel (hoisted out of the k loop);
        # each (c, k) tap is a pure full-vreg FMA on a contiguous lane window.
        acc = None
        for c in range(Cin):
            xc = jnp.broadcast_to(x[:, c:c + 1, :], (B, c_blk, TM))       # (B, c_blk, T*m)
            for k in range(K):
                off = k * dil * m
                w_col = P[:, k * Cin + c: k * Cin + c + 1][None, :, :]    # (1, c_blk, 1)
                term = xc[:, :, off:off + L] * w_col                      # (B, c_blk, L)
                acc = term if acc is None else acc + term

        # ---- nn.BatchNorm2d (training mode: biased batch stats, eps=1e-5) ------
        # Batch axis first (cheap VPU adds across vregs), then one lane-axis XLU
        # reduce per statistic.  Two-pass (centered) variance; `centered` is
        # reused by the affine so the second pass is ~free.
        s1 = jnp.sum(jnp.sum(acc, axis=0), axis=-1, keepdims=True)        # (c_blk, 1)
        mean = s1 * inv_n
        centered = acc - mean[None, :, :]                                 # (B, c_blk, L)
        s2 = jnp.sum(jnp.sum(centered * centered, axis=0), axis=-1, keepdims=True)
        var = s2 * inv_n                                                  # (c_blk, 1)
        scale = gamma * jax.lax.rsqrt(var + eps)                          # (c_blk, 1)
        y = centered * scale[None, :, :] + beta[None, :, :]               # (B, c_blk, L)

        # ---- nn.AdaptiveMaxPool2d((hidP, m)) + nn.Tanh --------------------------
        # Lane-dense epilogue: pooled result stays (B, c_blk, hidP*m), channels on
        # sublanes (no 1-sublane tiles / masked per-channel stores).
        if use_pool:
            pools = []
            for p in range(hidP):
                s0 = (p * T_out) // hidP
                e0 = ((p + 1) * T_out + hidP - 1) // hidP
                seg = y if (s0 == 0 and e0 == T_out) else y[:, :, s0 * m:e0 * m]
                pools.append(_tree_max_blocks(seg, e0 - s0, m))           # (B, c_blk, m)
            pooled = pools[0] if hidP == 1 else jnp.concatenate(pools, axis=-1)
            o_ref[...] = jnp.tanh(pooled)                                 # (B, c_blk, hidP*m)
        else:
            o_ref[...] = jnp.tanh(y)                                      # (B, c_blk, T_out*m)

    return kernel, T_out


def pack_conv_branch_params(params):
    """Pack conv weights + BN affine into one (Cout, K*Cin + 2) tile.
    Done ONCE at parameter-init time, not per forward call.  The conv bias is
    intentionally dropped: training-mode BatchNorm cancels it exactly."""
    w = params["conv_w"]                                    # (Cout, Cin, K, 1) OIHW
    Cout, Cin, K, _ = w.shape
    # column k*Cin + c holds w[:, c, k, 0]
    w_cols = jnp.transpose(w[..., 0], (0, 2, 1)).reshape(Cout, K * Cin)
    return jnp.concatenate(
        [w_cols.astype(jnp.float32),
         params["bn_w"].reshape(Cout, 1).astype(jnp.float32),
         params["bn_b"].reshape(Cout, 1).astype(jnp.float32)],
        axis=1)                                             # (Cout, K*Cin + 2)


@partial(jax.jit, static_argnames=("kernel_size", "dilation_factor", "hidP", "isPool"))
def conv_branch_forward(x_nchw, packed_params, *, kernel_size, dilation_factor=2,
                        hidP=1, isPool=True):
    """Pallas ConvBranch.forward.
    x_nchw: (B, in_ch, T, m) f32 (PyTorch NCHW); packed_params from pack_conv_branch_params.
    Returns (B, out_ch * H_pool, m), matching `x.view(bs, -1, x.size(-1))`."""
    B, Cin, T, m = x_nchw.shape
    Cout = packed_params.shape[0]
    K = kernel_size
    dil = dilation_factor
    use_pool = bool(isPool and hidP is not None)

    # "parallel" grid over output-channel blocks: BN stats are per-channel, so
    # blocks are independent -> Mosaic can shard them across both v7x TensorCores
    # and per-step VMEM stays bounded at production Cout (grid is (1,) here).
    c_blk = 8 if Cout % 8 == 0 else Cout
    n_cblk = Cout // c_blk

    kernel, T_out = _make_kernel(B, T, m, Cin, c_blk, K, dil, hidP, use_pool)
    out_lanes = hidP * m if use_pool else T_out * m

    # Free contiguous reshape (no transpose): NCHW -> (B, Cin, T*m),
    # time*regions on the 128-wide lane dim, Cin on sublanes.
    x_k = x_nchw.reshape(B, Cin, T * m).astype(jnp.float32)

    out = pl.pallas_call(
        kernel,
        out_shape=jax.ShapeDtypeStruct((B, Cout, out_lanes), jnp.float32),
        grid=(n_cblk,),
        in_specs=[
            pl.BlockSpec((B, Cin, T * m), lambda i: (0, 0, 0)),
            pl.BlockSpec((c_blk, packed_params.shape[1]), lambda i: (i, 0)),
        ],
        out_specs=pl.BlockSpec((B, c_blk, out_lanes), lambda i: (0, i, 0)),
        compiler_params=pltpu.CompilerParams(dimension_semantics=("parallel",)),
        # Working set is a few hundred KiB; default scoped VMEM is plenty.  At
        # production shapes set vmem_limit_bytes explicitly and grid over B/time.
    )(x_k, packed_params)

    # PyTorch: x.view(bs, -1, m) — contiguous reshape only, free.
    return out.reshape(B, -1, m)


def conv_branch_reference(x_nchw, params, *, kernel_size, dilation_factor=2,
                          hidP=1, isPool=True, eps=1e-5):
    """Plain-JAX mirror of the PyTorch module (with conv bias), for validation."""
    w = params["conv_w"].astype(jnp.float32)
    conv = jax.lax.conv_general_dilated(
        x_nchw.astype(jnp.float32), w, window_strides=(1, 1), padding="VALID",
        rhs_dilation=(dilation_factor, 1),
        dimension_numbers=("NCHW", "OIHW", "NCHW"),
        precision=jax.lax.Precision.HIGHEST)
    conv = conv + params["conv_b"][None, :, None, None]
    mean = conv.mean(axis=(0, 2, 3), keepdims=True)
    var = ((conv - mean) ** 2).mean(axis=(0, 2, 3), keepdims=True)
    y = (conv - mean) / jnp.sqrt(var + eps)
    y = y * params["bn_w"][None, :, None, None] + params["bn_b"][None, :, None, None]
    if isPool and hidP is not None:
        _, _, Hq, _ = y.shape
        pools = []
        for p in range(hidP):
            s0 = (p * Hq) // hidP
            e0 = ((p + 1) * Hq + hidP - 1) // hidP
            pools.append(jnp.max(y[:, :, s0:e0, :], axis=2, keepdims=True))
        y = pools[0] if hidP == 1 else jnp.concatenate(pools, axis=2)
    bs = y.shape[0]
    return jnp.tanh(y.reshape(bs, -1, y.shape[-1]))


if __name__ == "__main__":
    # Small shapes consistent with ConvBranch(m, in_ch, out_ch, k, dil, hidP)
    B, Cin, Cout, T, m = 2, 4, 8, 16, 16
    K, DIL, HIDP = 3, 2, 1

    key = jax.random.PRNGKey(0)
    kw, kb, kg, kbt, kx = jax.random.split(key, 5)
    bound = 1.0 / math.sqrt(Cin * K)            # PyTorch Conv2d default-ish init
    params = {
        "conv_w": jax.random.uniform(kw, (Cout, Cin, K, 1), jnp.float32,
                                     minval=-bound, maxval=bound),
        "conv_b": jax.random.uniform(kb, (Cout,), jnp.float32,
                                     minval=-bound, maxval=bound),
        "bn_w": 1.0 + 0.1 * jax.random.normal(kg, (Cout,), jnp.float32),
        "bn_b": 0.1 * jax.random.normal(kbt, (Cout,), jnp.float32),
    }
    x = jax.random.normal(kx, (B, Cin, T, m), jnp.float32)   # NCHW

    P = pack_conv_branch_params(params)        # once, at parameter-init time
    out = conv_branch_forward(x, P, kernel_size=K,
                              dilation_factor=DIL, hidP=HIDP, isPool=True)
    out = jax.block_until_ready(out)

    ref = conv_branch_reference(x, params, kernel_size=K,
                                dilation_factor=DIL, hidP=HIDP, isPool=True)
    assert out.shape == (B, Cout * HIDP, m), out.shape
    if not bool(jnp.allclose(out, ref, atol=5e-3, rtol=5e-3)):
        raise RuntimeError("Pallas kernel mismatch vs reference, max err = "
                           f"{float(jnp.max(jnp.abs(out - ref)))}")
    print("KERNEL_OK")
</pallas_src>

<mosaic_0001>
module attributes {stable_mosaic.version = 11 : i64} {
  func.func @kernel(%arg0: i32, %arg1: memref<2x4x256xf32, #tpu.memory_space<vmem>>, %arg2: memref<8x14xf32, #tpu.memory_space<vmem>>, %arg3: memref<2x8x16xf32, #tpu.memory_space<vmem>>) attributes {dimension_semantics = [#tpu.dimension_semantics<parallel>], iteration_bounds = array<i64: 1>, scalar_prefetch = 0 : i64, scratch_operands = 0 : i64, tpu.core_type = #tpu.core_type<tc>, window_params = [{pipeline_mode = #tpu.pipeline_mode<synchronous>, transform_indices = @transform_0, window_bounds = array<i64: 2, 4, 256>}, {transform_indices = @transform_1, window_bounds = array<i64: 8, 14>}, {transform_indices = @transform_2, window_bounds = array<i64: 2, 8, 16>}]} {
    %c0 = arith.constant 0 : index
    %c0_0 = arith.constant 0 : index
    %c0_1 = arith.constant 0 : index
    %0 = vector.load %arg1[%c0, %c0_0, %c0_1] : memref<2x4x256xf32, #tpu.memory_space<vmem>>, vector<2x4x256xf32>
    %c0_2 = arith.constant 0 : index
    %c0_3 = arith.constant 0 : index
    %1 = vector.load %arg2[%c0_2, %c0_3] : memref<8x14xf32, #tpu.memory_space<vmem>>, vector<8x14xf32>
    %2 = vector.extract_strided_slice %1 {offsets = [0, 12], sizes = [8, 1], strides = [1, 1]} : vector<8x14xf32> to vector<8x1xf32>
    %3 = vector.extract_strided_slice %1 {offsets = [0, 13], sizes = [8, 1], strides = [1, 1]} : vector<8x14xf32> to vector<8x1xf32>
    %4 = vector.extract_strided_slice %0 {offsets = [0, 0, 0], sizes = [2, 1, 256], strides = [1, 1, 1]} : vector<2x4x256xf32> to vector<2x1x256xf32>
    %5 = vector.shape_cast %4 : vector<2x1x256xf32> to vector<2x1x256xf32>
    %6 = vector.broadcast %5 : vector<2x1x256xf32> to vector<2x8x256xf32>
    %7 = vector.extract_strided_slice %1 {offsets = [0, 0], sizes = [8, 1], strides = [1, 1]} : vector<8x14xf32> to vector<8x1xf32>
    %8 = vector.shape_cast %7 : vector<8x1xf32> to vector<1x8x1xf32>
    %9 = vector.extract_strided_slice %6 {offsets = [0, 0, 0], sizes = [2, 8, 192], strides = [1, 1, 1]} : vector<2x8x256xf32> to vector<2x8x192xf32>
    %10 = vector.broadcast %8 : vector<1x8x1xf32> to vector<2x8x192xf32>
    %11 = arith.mulf %9, %10 : vector<2x8x192xf32>
    %12 = vector.extract_strided_slice %1 {offsets = [0, 4], sizes = [8, 1], strides = [1, 1]} : vector<8x14xf32> to vector<8x1xf32>
    %13 = vector.shape_cast %12 : vector<8x1xf32> to vector<1x8x1xf32>
    %14 = vector.extract_strided_slice %6 {offsets = [0, 0, 32], sizes = [2, 8, 192], strides = [1, 1, 1]} : vector<2x8x256xf32> to vector<2x8x192xf32>
    %15 = vector.broadcast %13 : vector<1x8x1xf32> to vector<2x8x192xf32>
    %16 = arith.mulf %14, %15 : vector<2x8x192xf32>
    %17 = arith.addf %11, %16 : vector<2x8x192xf32>
    %18 = vector.extract_strided_slice %1 {offsets = [0, 8], sizes = [8, 1], strides = [1, 1]} : vector<8x14xf32> to vector<8x1xf32>
    %19 = vector.shape_cast %18 : vector<8x1xf32> to vector<1x8x1xf32>
    %20 = vector.extract_strided_slice %6 {offsets = [0, 0, 64], sizes = [2, 8, 192], strides = [1, 1, 1]} : vector<2x8x256xf32> to vector<2x8x192xf32>
    %21 = vector.broadcast %19 : vector<1x8x1xf32> to vector<2x8x192xf32>
    %22 = arith.mulf %20, %21 : vector<2x8x192xf32>
    %23 = arith.addf %17, %22 : vector<2x8x192xf32>
    %24 = vector.extract_strided_slice %0 {offsets = [0, 1, 0], sizes = [2, 1, 256], strides = [1, 1, 1]} : vector<2x4x256xf32> to vector<2x1x256xf32>
    %25 = vector.shape_cast %24 : vector<2x1x256xf32> to vector<2x1x256xf32>
    %26 = vector.broadcast %25 : vector<2x1x256xf32> to vector<2x8x256xf32>
    %27 = vector.extract_strided_slice %1 {offsets = [0, 1], sizes = [8, 1], strides = [1, 1]} : vector<8x14xf32> to vector<8x1xf32>
    %28 = vector.shape_cast %27 : vector<8x1xf32> to vector<1x8x1xf32>
    %29 = vector.extract_strided_slice %26 {offsets = [0, 0, 0], sizes = [2, 8, 192], strides = [1, 1, 1]} : vector<2x8x256xf32> to vector<2x8x192xf32>
    %30 = vector.broadcast %28 : vector<1x8x1xf32> to vector<2x8x192xf32>
    %31 = arith.mulf %29, %30 : vector<2x8x192xf32>
    %32 = arith.addf %23, %31 : vector<2x8x192xf32>
    %33 = vector.extract_strided_slice %1 {offsets = [0, 5], sizes = [8, 1], strides = [1, 1]} : vector<8x14xf32> to vector<8x1xf32>
    %34 = vector.shape_cast %33 : vector<8x1xf32> to vector<1x8x1xf32>
    %35 = vector.extract_strided_slice %26 {offsets = [0, 0, 32], sizes = [2, 8, 192], strides = [1, 1, 1]} : vector<2x8x256xf32> to vector<2x8x192xf32>
    %36 = vector.broadcast %34 : vector<1x8x1xf32> to vector<2x8x192xf32>
    %37 = arith.mulf %35, %36 : vector<2x8x192xf32>
    %38 = arith.addf %32, %37 : vector<2x8x192xf32>
    %39 = vector.extract_strided_slice %1 {offsets = [0, 9], sizes = [8, 1], strides = [1, 1]} : vector<8x14xf32> to vector<8x1xf32>
    %40 = vector.shape_cast %39 : vector<8x1xf32> to vector<1x8x1xf32>
    %41 = vector.extract_strided_slice %26 {offsets = [0, 0, 64], sizes = [2, 8, 192], strides = [1, 1, 1]} : vector<2x8x256xf32> to vector<2x8x192xf32>
    %42 = vector.broadcast %40 : vector<1x8x1xf32> to vector<2x8x192xf32>
    %43 = arith.mulf %41, %42 : vector<2x8x192xf32>
    %44 = arith.addf %38, %43 : vector<2x8x192xf32>
    %45 = vector.extract_strided_slice %0 {offsets = [0, 2, 0], sizes = [2, 1, 256], strides = [1, 1, 1]} : vector<2x4x256xf32> to vector<2x1x256xf32>
    %46 = vector.shape_cast %45 : vector<2x1x256xf32> to vector<2x1x256xf32>
    %47 = vector.broadcast %46 : vector<2x1x256xf32> to vector<2x8x256xf32>
    %48 = vector.extract_strided_slice %1 {offsets = [0, 2], sizes = [8, 1], strides = [1, 1]} : vector<8x14xf32> to vector<8x1xf32>
    %49 = vector.shape_cast %48 : vector<8x1xf32> to vector<1x8x1xf32>
    %50 = vector.extract_strided_slice %47 {offsets = [0, 0, 0], sizes = [2, 8, 192], strides = [1, 1, 1]} : vector<2x8x256xf32> to vector<2x8x192xf32>
    %51 = vector.broadcast %49 : vector<1x8x1xf32> to vector<2x8x192xf32>
    %52 = arith.mulf %50, %51 : vector<2x8x192xf32>
    %53 = arith.addf %44, %52 : vector<2x8x192xf32>
    %54 = vector.extract_strided_slice %1 {offsets = [0, 6], sizes = [8, 1], strides = [1, 1]} : vector<8x14xf32> to vector<8x1xf32>
    %55 = vector.shape_cast %54 : vector<8x1xf32> to vector<1x8x1xf32>
    %56 = vector.extract_strided_slice %47 {offsets = [0, 0, 32], sizes = [2, 8, 192], strides = [1, 1, 1]} : vector<2x8x256xf32> to vector<2x8x192xf32>
    %57 = vector.broadcast %55 : vector<1x8x1xf32> to vector<2x8x192xf32>
    %58 = arith.mulf %56, %57 : vector<2x8x192xf32>
    %59 = arith.addf %53, %58 : vector<2x8x192xf32>
    %60 = vector.extract_strided_slice %1 {offsets = [0, 10], sizes = [8, 1], strides = [1, 1]} : vector<8x14xf32> to vector<8x1xf32>
    %61 = vector.shape_cast %60 : vector<8x1xf32> to vector<1x8x1xf32>
    %62 = vector.extract_strided_slice %47 {offsets = [0, 0, 64], sizes = [2, 8, 192], strides = [1, 1, 1]} : vector<2x8x256xf32> to vector<2x8x192xf32>
    %63 = vector.broadcast %61 : vector<1x8x1xf32> to vector<2x8x192xf32>
    %64 = arith.mulf %62, %63 : vector<2x8x192xf32>
    %65 = arith.addf %59, %64 : vector<2x8x192xf32>
    %66 = vector.extract_strided_slice %0 {offsets = [0, 3, 0], sizes = [2, 1, 256], strides = [1, 1, 1]} : vector<2x4x256xf32> to vector<2x1x256xf32>
    %67 = vector.shape_cast %66 : vector<2x1x256xf32> to vector<2x1x256xf32>
    %68 = vector.broadcast %67 : vector<2x1x256xf32> to vector<2x8x256xf32>
    %69 = vector.extract_strided_slice %1 {offsets = [0, 3], sizes = [8, 1], strides = [1, 1]} : vector<8x14xf32> to vector<8x1xf32>
    %70 = vector.shape_cast %69 : vector<8x1xf32> to vector<1x8x1xf32>
    %71 = vector.extract_strided_slice %68 {offsets = [0, 0, 0], sizes = [2, 8, 192], strides = [1, 1, 1]} : vector<2x8x256xf32> to vector<2x8x192xf32>
    %72 = vector.broadcast %70 : vector<1x8x1xf32> to vector<2x8x192xf32>
    %73 = arith.mulf %71, %72 : vector<2x8x192xf32>
    %74 = arith.addf %65, %73 : vector<2x8x192xf32>
    %75 = vector.extract_strided_slice %1 {offsets = [0, 7], sizes = [8, 1], strides = [1, 1]} : vector<8x14xf32> to vector<8x1xf32>
    %76 = vector.shape_cast %75 : vector<8x1xf32> to vector<1x8x1xf32>
    %77 = vector.extract_strided_slice %68 {offsets = [0, 0, 32], sizes = [2, 8, 192], strides = [1, 1, 1]} : vector<2x8x256xf32> to vector<2x8x192xf32>
    %78 = vector.broadcast %76 : vector<1x8x1xf32> to vector<2x8x192xf32>
    %79 = arith.mulf %77, %78 : vector<2x8x192xf32>
    %80 = arith.addf %74, %79 : vector<2x8x192xf32>
    %81 = vector.extract_strided_slice %1 {offsets = [0, 11], sizes = [8, 1], strides = [1, 1]} : vector<8x14xf32> to vector<8x1xf32>
    %82 = vector.shape_cast %81 : vector<8x1xf32> to vector<1x8x1xf32>
    %83 = vector.extract_strided_slice %68 {offsets = [0, 0, 64], sizes = [2, 8, 192], strides = [1, 1, 1]} : vector<2x8x256xf32> to vector<2x8x192xf32>
    %84 = vector.broadcast %82 : vector<1x8x1xf32> to vector<2x8x192xf32>
    %85 = arith.mulf %83, %84 : vector<2x8x192xf32>
    %86 = arith.addf %80, %85 : vector<2x8x192xf32>
    %cst = arith.constant dense<0.000000e+00> : vector<8x192xf32>
    %87 = vector.multi_reduction <add>, %86, %cst [0] : vector<2x8x192xf32> to vector<8x192xf32>
    %cst_4 = arith.constant dense<0.000000e+00> : vector<8xf32>
    %88 = vector.multi_reduction <add>, %87, %cst_4 [1] : vector<8x192xf32> to vector<8xf32>
    %89 = vector.shape_cast %88 : vector<8xf32> to vector<8x1xf32>
    %cst_5 = arith.constant 0.00260416674 : f32
    %90 = vector.broadcast %cst_5 : f32 to vector<8x1xf32>
    %91 = arith.mulf %89, %90 : vector<8x1xf32>
    %92 = vector.shape_cast %91 : vector<8x1xf32> to vector<1x8x1xf32>
    %93 = vector.broadcast %92 : vector<1x8x1xf32> to vector<2x8x192xf32>
    %94 = arith.subf %86, %93 : vector<2x8x192xf32>
    %95 = arith.mulf %94, %94 : vector<2x8x192xf32>
    %cst_6 = arith.constant dense<0.000000e+00> : vector<8x192xf32>
    %96 = vector.multi_reduction <add>, %95, %cst_6 [0] : vector<2x8x192xf32> to vector<8x192xf32>
    %cst_7 = arith.constant dense<0.000000e+00> : vector<8xf32>
    %97 = vector.multi_reduction <add>, %96, %cst_7 [1] : vector<8x192xf32> to vector<8xf32>
    %98 = vector.shape_cast %97 : vector<8xf32> to vector<8x1xf32>
    %cst_8 = arith.constant 0.00260416674 : f32
    %99 = vector.broadcast %cst_8 : f32 to vector<8x1xf32>
    %100 = arith.mulf %98, %99 : vector<8x1xf32>
    %cst_9 = arith.constant 9.99999974E-6 : f32
    %101 = vector.broadcast %cst_9 : f32 to vector<8x1xf32>
    %102 = arith.addf %100, %101 : vector<8x1xf32>
    %103 = math.rsqrt %102 : vector<8x1xf32>
    %104 = arith.mulf %2, %103 : vector<8x1xf32>
    %105 = vector.shape_cast %104 : vector<8x1xf32> to vector<1x8x1xf32>
    %106 = vector.broadcast %105 : vector<1x8x1xf32> to vector<2x8x192xf32>
    %107 = arith.mulf %94, %106 : vector<2x8x192xf32>
    %108 = vector.shape_cast %3 : vector<8x1xf32> to vector<1x8x1xf32>
    %109 = vector.broadcast %108 : vector<1x8x1xf32> to vector<2x8x192xf32>
    %110 = arith.addf %107, %109 : vector<2x8x192xf32>
    %111 = vector.extract_strided_slice %110 {offsets = [0, 0, 0], sizes = [2, 8, 96], strides = [1, 1, 1]} : vector<2x8x192xf32> to vector<2x8x96xf32>
    %112 = vector.extract_strided_slice %110 {offsets = [0, 0, 96], sizes = [2, 8, 96], strides = [1, 1, 1]} : vector<2x8x192xf32> to vector<2x8x96xf32>
    %113 = arith.maximumf %111, %112 : vector<2x8x96xf32>
    %114 = vector.extract_strided_slice %113 {offsets = [0, 0, 0], sizes = [2, 8, 48], strides = [1, 1, 1]} : vector<2x8x96xf32> to vector<2x8x48xf32>
    %115 = vector.extract_strided_slice %113 {offsets = [0, 0, 48], sizes = [2, 8, 48], strides = [1, 1, 1]} : vector<2x8x96xf32> to vector<2x8x48xf32>
    %116 = arith.maximumf %114, %115 : vector<2x8x48xf32>
    %117 = vector.extract_strided_slice %116 {offsets = [0, 0, 32], sizes = [2, 8, 16], strides = [1, 1, 1]} : vector<2x8x48xf32> to vector<2x8x16xf32>
    %118 = vector.extract_strided_slice %116 {offsets = [0, 0, 0], sizes = [2, 8, 16], strides = [1, 1, 1]} : vector<2x8x48xf32> to vector<2x8x16xf32>
    %119 = vector.extract_strided_slice %116 {offsets = [0, 0, 16], sizes = [2, 8, 16], strides = [1, 1, 1]} : vector<2x8x48xf32> to vector<2x8x16xf32>
    %120 = arith.maximumf %118, %119 : vector<2x8x16xf32>
    %121 = arith.maximumf %120, %117 : vector<2x8x16xf32>
    %122 = math.tanh %121 : vector<2x8x16xf32>
    %c0_10 = arith.constant 0 : index
    %c0_11 = arith.constant 0 : index
    %c0_12 = arith.constant 0 : index
    %123 = vector.load %arg3[%c0_10, %c0_11, %c0_12] : memref<2x8x16xf32, #tpu.memory_space<vmem>>, vector<2x8x16xf32>
    tpu.vector_store %arg3[%c0_10, %c0_11, %c0_12], %122 {strides = array<i32>} : memref<2x8x16xf32, #tpu.memory_space<vmem>>, vector<2x8x16xf32>,
    return
  }
  func.func @transform_0(%arg0: i32) -> (i32, i32, i32) {
    %c0_i32 = arith.constant 0 : i32
    %c0_i32_0 = arith.constant 0 : i32
    %c0_i32_1 = arith.constant 0 : i32
    %c0_i32_2 = arith.constant 0 : i32
    return %c0_i32, %c0_i32_0, %c0_i32_1 : i32, i32, i32
  }
  func.func @transform_1(%arg0: i32) -> (i32, i32) {
    %c0_i32 = arith.constant 0 : i32
    %c0_i32_0 = arith.constant 0 : i32
    return %arg0, %c0_i32 : i32, i32
  }
  func.func @transform_2(%arg0: i32) -> (i32, i32, i32) {
    %c0_i32 = arith.constant 0 : i32
    %c0_i32_0 = arith.constant 0 : i32
    %c0_i32_1 = arith.constant 0 : i32
    return %c0_i32, %arg0, %c0_i32_0 : i32, i32, i32
  }
}

</mosaic_0001>

<bundles_post_ra>
// kernel: conv_branch_forward.1
= control target key start
LH: loop header
LB: loop body
LE: loop exit
PB: predicated region body
PF: predicated region fallthrough
CT: control target
= control target key end

     0   :  { %v629_v1 = vmov 4   ;;  %v630_v2 = vmov 5   ;;  %s881_s0 = inlined_call_operand.vmem [shape: f32[2,4,256], index: 0, kind: input, shape index: {}]   ;;  %s882_s1 = inlined_call_operand.vmem [shape: f32[8,14], index: 1, kind: input, shape index: {}]   ;;  %s883_s2 = inlined_call_operand.hbm [shape: f32[2,8,16], index: 2, kind: output, shape index: {}]  }
   0x1   :  { %v669_v0 = vld [vmem:[%s882_s1] sm:$0xff]  ;;  %584 = vset.pattern.permute.xlu0 %v629_v1  ;;  %586 = vset.pattern.permute.xlu1 %v630_v2 }
   0x2   :  { %63 = vperm.xlu0 %584, %v669_v0   ;;  %173 = vperm.xlu1 %586, %v669_v0  }
   0x3   :  { %7 = vsyncpa [#allocation3], 0  ;;  %v631_v3 = vmov 8   ;;  %v632_v4 = vmov 9   ;;  %v633_v5 = vmov 6   ;;  %v634_v6 = vmov 10  }
   0x4   :  { %v635_v7 = vmov 7   ;;  %v636_v8 = vmov 0   ;;  %v637_v9 = vmov 11   ;;  %v638_v10 = vmov 3   ;;  %v689_v16 = vld [vmem:[%s881_s0 + $0x8] sm:$0xff]  ;;  %v694_v17 = vld [vmem:[%s881_s0] sm:$0xff] }
   0x5   :  { %v639_v11 = vmov 1   ;;  %v640_v12 = vmov 2   ;;  %v17_v13 = vlaneseq  ;;  %s641_s0 = smov 96   ;;  %s642_s14 = smov 64   ;;  %vm82_vm0 = vcmask 785408  }
   0x6   :  { %585 = vset.pattern.permute.xlu0 %v631_v3  ;;  %587 = vset.pattern.permute.xlu1 %v632_v4  ;;  %vm113_vm1 = vcmask 523264   ;;  %s645_s15 = smov 32   ;;  %vm506_vm2 = vcmask 261120   ;;  %s646_s16 = smov 80   ;;  %vm543_vm3 = vcmask 130048  }
   0x7   :  { %94 = vperm.xlu0 %585, %v669_v0   ;;  %203 = vperm.xlu1 %587, %v669_v0   ;;  %v683_v14 = vshrl.u32 %v17_v13, 7  ;;  %s647_s17 = smov 112   ;;  %s648_s18 = smov [#allocation2]  }
   0x8   :  { %s551_s19 = sshll.u32 %s648_s18, 4  ;;  %s552_s19 = int_to_ptr.vmem [resolvable:$true] %s551_s19 }
   0x9   :  { %v23_v15 = vsub.s32 4, %v683_v14  ;;  %v19_v18 = vsub.s32 0, %v683_v14  ;;  %v130_v30 = vsub.s32 5, %v683_v14  ;;  %v126_v38 = vsub.s32 1, %v683_v14  ;;  %s605_s20 = scalar_lea.vmem %s552_s19, 256  ;;  %p610_p1 = scmp.lt.s32.totalorder %s552_s19, %s552_s19 }
   0xa   :  { %v238_v46 = vsub.s32 6, %v683_v14  ;;  %v234_v52 = vsub.s32 2, %v683_v14  ;;  %v346_v4 = vsub.s32 7, %v683_v14  ;;  %p606_p0 = scmp.ne.s32.totalorder %s552_s19, %s605_s20  ;;  %p611_p2 = scmp.lt.s32.totalorder %s605_s20, %s605_s20 }
   0xb   :  { %588 = vset.pattern.permute.xlu1 %v633_v5  ;;  %589 = vset.pattern.permute.xlu0 %v634_v6  ;;  %v32_v19 = vrot.slane %v689_v16, %v23_v15  ;;  %v24_v20 = vrot.slane %v694_v17, %v23_v15  ;;  %v28_v23 = vrot.slane %v689_v16, %v19_v18 }
   0xc   :  { %281 = vperm.xlu1 %588, %v669_v0   ;;  %311 = vperm.xlu0 %589, %v669_v0   ;;  %v20_v24 = vrot.slane %v694_v17, %v19_v18  ;;  %v131_v34 = vrot.slane %v694_v17, %v130_v30  ;;  %v139_v37 = vrot.slane %v689_v16, %v130_v30  ;;  %p612_p3 = por %p611_p2, %p610_p1 }
   0xd   :  { %v699_v21 = vrot.slane %v32_v19, %v19_v18  ;;  %v701_v22 = vrot.slane %v24_v20, %v19_v18  ;;  %v707_v28 = vrot.slane %v28_v23, %v19_v18  ;;  %v127_v44 = vrot.slane %v694_v17, %v126_v38 }
   0xe   :  { %v709_v29 = vrot.slane %v20_v24, %v19_v18  ;;  %v725_v39 = vrot.slane %v131_v34, %v126_v38  ;;  %v727_v40 = vrot.slane %v139_v37, %v126_v38  ;;  %v135_v45 = vrot.slane %v689_v16, %v126_v38  ;;  %p613_p4 = pnand %p612_p3, %p606_p0 }
   0xf   :  { %v738_v49 = vrot.slane %v127_v44, %v126_v38  ;;  %v239_v53 = vrot.slane %v694_v17, %v238_v46  ;;  %v235_v59 = vrot.slane %v694_v17, %v234_v52  ;;  %v247_v63 = vrot.slane %v689_v16, %v238_v46 }
  0x10   :  { %590 = vset.pattern.permute.xlu1 %v635_v7  ;;  %592 = vset.pattern.permute.xlu0 %v636_v8  ;;  %v740_v50 = vrot.slane %v135_v45, %v126_v38  ;;  %v243_v7 = vrot.slane %v689_v16, %v234_v52  ;;  %v355_v24 = vrot.slane %v689_v16, %v346_v4 }
  0x11   :  { %389 = vperm.xlu1 %590, %v669_v0   ;;  %55 = vperm.xlu0 %592, %v669_v0   ;;  %v748_v56 = vrot.slane %v239_v53, %v234_v52  ;;  %v758_v62 = vrot.slane %v235_v59, %v234_v52  ;;  %v765_v3 = vrot.slane %v247_v63, %v234_v52 }
  0x15   :  { %591 = vset.pattern.permute.xlu1 %v637_v9  ;;  %595 = vset.pattern.permute.xlu0 %v638_v10  ;;  %v342_v10 = vsub.s32 3, %v683_v14 }
  0x16   :  { %419 = vperm.xlu1 %591, %v669_v0   ;;  %377 = vperm.xlu0 %595, %v669_v0  }
  0x17   :  { %v343_v13 = vrot.slane %v694_v17, %v342_v10 }
  0x19   :  { %v785_v23 = vrot.slane %v343_v13, %v342_v10 }
  0x1a   :  { %593 = vset.pattern.permute.xlu1 %v639_v11  ;;  %v347_v11 = vrot.slane %v694_v17, %v346_v4 }
  0x1b   :  { %161 = vperm.xlu1 %593, %v669_v0  }
  0x1c   :  { %v782_v18 = vrot.slane %v347_v11, %v342_v10 }
  0x1f   :  { %594 = vset.pattern.permute.xlu1 %v640_v12  ;;  %v776_v12 = vrot.slane %v243_v7, %v234_v52 }
  0x20   :  { %269 = vperm.xlu1 %594, %v669_v0  }
  0x81   :  { %v64_v25 = vpop.permute.xlu0 %63  ;;  %v174_v41 = vpop.permute.xlu1 %173 }
  0x82   :  { %v69_v26 = vmul.f32 %v64_v25, %v699_v21  ;;  %v67_v27 = vmul.f32 %v64_v25, %v701_v22  ;;  %v68_v31 = vmul.f32 %v64_v25, %v707_v28  ;;  %v66_v32 = vmul.f32 %v64_v25, %v709_v29 }
  0x83   :  { %v177_v47 = vmul.f32 %v174_v41, %v725_v39  ;;  %v179_v48 = vmul.f32 %v174_v41, %v727_v40  ;;  %v176_v54 = vmul.f32 %v174_v41, %v738_v49  ;;  %v178_v55 = vmul.f32 %v174_v41, %v740_v50 }
  0x84   :  { %80 = vrot.lane.b32.xlu0 %v69_v26, %s641_s0  ;;  %76 = vrot.lane.b32.xlu1 %v67_v27, %s641_s0  ;;  %v795_v26 = vrot.slane %v355_v24, %v342_v10 }
  0x86   :  { %v95_v33 = vpop.permute.xlu0 %94  ;;  %v204_v51 = vpop.permute.xlu1 %203 }
  0x87   :  { %v98_v35 = vmul.f32 %v95_v33, %v701_v22  ;;  %v100_v36 = vmul.f32 %v95_v33, %v699_v21  ;;  %v97_v42 = vmul.f32 %v95_v33, %v709_v29  ;;  %v99_v43 = vmul.f32 %v95_v33, %v707_v28 }
  0x88   :  { %78 = vrot.lane.b32.xlu0 %v68_v31, %s641_s0  ;;  %74 = vrot.lane.b32.xlu1 %v66_v32, %s641_s0  ;;  %v206_v57 = vmul.f32 %v204_v51, %v738_v49  ;;  %v207_v58 = vmul.f32 %v204_v51, %v725_v39  ;;  %v209_v1 = vmul.f32 %v204_v51, %v727_v40 }
  0x89   :  { %v208_v6 = vmul.f32 %v204_v51, %v740_v50  ;;  %v351_v31 = vrot.slane %v689_v16, %v342_v10 }
  0x8b   :  { %v282_v60 = vpop.permute.xlu1 %281  ;;  %v312_v5 = vpop.permute.xlu0 %311  ;;  %v803_v34 = vrot.slane %v351_v31, %v342_v10 }
  0x8c   :  { %107 = vrot.lane.b32.xlu0 %v98_v35, %s642_s14  ;;  %111 = vrot.lane.b32.xlu1 %v100_v36, %s642_s14  ;;  %v285_v61 = vmul.f32 %v282_v60, %v748_v56  ;;  %v284_v2 = vmul.f32 %v282_v60, %v758_v62  ;;  %v315_v8 = vmul.f32 %v312_v5, %v748_v56 }
  0x8d   :  { %v287_v9 = vmul.f32 %v282_v60, %v765_v3  ;;  %v314_v15 = vmul.f32 %v312_v5, %v758_v62  ;;  %v286_v20 = vmul.f32 %v282_v60, %v776_v12  ;;  %v317_v17 = vmul.f32 %v312_v5, %v765_v3 }
  0x8e   :  { %v316_v30 = vmul.f32 %v312_v5, %v776_v12 }
  0x90   :  { %105 = vrot.lane.b32.xlu0 %v97_v42, %s642_s14  ;;  %109 = vrot.lane.b32.xlu1 %v99_v43, %s642_s14  ;;  %v390_v19 = vpop.permute.xlu1 %389  ;;  %v56_v41 = vpop.permute.xlu0 %55 }
  0x91   :  { %v393_v14 = vmul.f32 %v390_v19, %v782_v18  ;;  %v392_v25 = vmul.f32 %v390_v19, %v785_v23  ;;  %v395_v33 = vmul.f32 %v390_v19, %v795_v26  ;;  %v394_v36 = vmul.f32 %v390_v19, %v803_v34 }
  0x92   :  { %v61_v46 = vmul.f32 %v56_v41, %v699_v21  ;;  %v60_v21 = vmul.f32 %v56_v41, %v707_v28 }
  0x94   :  { %186 = vrot.lane.b32.xlu0 %v177_v47, %s641_s0  ;;  %190 = vrot.lane.b32.xlu1 %v179_v48, %s641_s0  ;;  %v59_v47 = vmul.f32 %v56_v41, %v701_v22  ;;  %v58_v22 = vmul.f32 %v56_v41, %v709_v29 }
  0x95   :  { %v420_v27 = vpop.permute.xlu1 %419  ;;  %v817_v43 = vpop.permute.xlu0 %377 }
  0x96   :  { %v423_v32 = vmul.f32 %v420_v27, %v782_v18  ;;  %v422_v35 = vmul.f32 %v420_v27, %v785_v23  ;;  %v425_v16 = vmul.f32 %v420_v27, %v795_v26  ;;  %v424_v37 = vmul.f32 %v420_v27, %v803_v34 }
  0x98   :  { %184 = vrot.lane.b32.xlu0 %v176_v54, %s641_s0  ;;  %188 = vrot.lane.b32.xlu1 %v178_v55, %s641_s0 }
  0x9a   :  { %v162_v38 = vpop.permute.xlu1 %161 }
  0x9c   :  { %214 = vrot.lane.b32.xlu0 %v206_v57, %s642_s14  ;;  %216 = vrot.lane.b32.xlu1 %v207_v58, %s642_s14  ;;  %v165_v57 = vmul.f32 %v162_v38, %v725_v39  ;;  %v167_v58 = vmul.f32 %v162_v38, %v727_v40 }
  0x9f   :  { %v815_v42 = vpop.permute.xlu1 %269 }
  0xa0   :  { %294 = vrot.lane.b32.xlu0 %v285_v61, %s641_s0  ;;  %220 = vrot.lane.b32.xlu1 %v209_v1, %s642_s14 }
  0xa4   :  { %292 = vrot.lane.b32.xlu0 %v284_v2, %s641_s0  ;;  %218 = vrot.lane.b32.xlu1 %v208_v6, %s642_s14 }
  0xa8   :  { %324 = vrot.lane.b32.xlu0 %v315_v8, %s642_s14  ;;  %298 = vrot.lane.b32.xlu1 %v287_v9, %s641_s0  ;;  %v164_v8 = vmul.f32 %v162_v38, %v738_v49  ;;  %v166_v9 = vmul.f32 %v162_v38, %v740_v50  ;;  %v273_v49 = vmul.f32 %v815_v42, %v748_v56 }
  0xa9   :  { %v272_v50 = vmul.f32 %v815_v42, %v758_v62  ;;  %v274_v62 = vmul.f32 %v815_v42, %v776_v12  ;;  %v380_v12 = vmul.f32 %v817_v43, %v785_v23  ;;  %v382_v23 = vmul.f32 %v817_v43, %v803_v34 }
  0xac   :  { %322 = vrot.lane.b32.xlu0 %v314_v15, %s642_s14  ;;  %296 = vrot.lane.b32.xlu1 %v286_v20, %s641_s0 }
  0xb0   :  { %402 = vrot.lane.b32.xlu0 %v393_v14, %s641_s0  ;;  %328 = vrot.lane.b32.xlu1 %v317_v17, %s642_s14 }
  0xb4   :  { %400 = vrot.lane.b32.xlu0 %v392_v25, %s641_s0  ;;  %326 = vrot.lane.b32.xlu1 %v316_v30, %s642_s14 }
  0xb8   :  { %432 = vrot.lane.b32.xlu0 %v423_v32, %s642_s14  ;;  %406 = vrot.lane.b32.xlu1 %v395_v33, %s641_s0 }
  0xbc   :  { %430 = vrot.lane.b32.xlu0 %v422_v35, %s642_s14  ;;  %404 = vrot.lane.b32.xlu1 %v394_v36, %s641_s0 }
  0xc0   :  { %436 = vrot.lane.b32.xlu1 %v425_v16, %s642_s14 }
  0xc4   :  { %434 = vrot.lane.b32.xlu1 %v424_v37, %s642_s14 }
  0xf6   :  { %v81_v44 = vpop.permute.xlu0 %80  ;;  %v77_v45 = vpop.permute.xlu1 %76 }
  0xf7   :  { %v92_v52 = vadd.f32 %v81_v44, %v61_v46  ;;  %v90_v53 = vadd.f32 %v77_v45, %v59_v47 }
  0xfa   :  { %v79_v48 = vpop.permute.xlu0 %78  ;;  %v75_v51 = vpop.permute.xlu1 %74 }
  0xfb   :  { %v84_v59 = vsel %vm82_vm0, %v79_v48, %v81_v44  ;;  %v83_v60 = vsel %vm82_vm0, %v75_v51, %v77_v45  ;;  %v275_v44 = vmul.f32 %v815_v42, %v765_v3  ;;  %v381_v3 = vmul.f32 %v817_v43, %v782_v18 }
  0xfc   :  { %v91_v4 = vadd.f32 %v84_v59, %v60_v21  ;;  %v89_v5 = vadd.f32 %v83_v60, %v58_v22  ;;  %v383_v18 = vmul.f32 %v817_v43, %v795_v26 }
  0xfe   :  { %v108_v54 = vpop.permute.xlu0 %107  ;;  %v112_v55 = vpop.permute.xlu1 %111 }
  0xff   :  { %v121_v61 = vadd.f32 %v108_v54, %v90_v53  ;;  %v123_v63 = vadd.f32 %v112_v55, %v92_v52 }
 0x101   :  { %v169_v1 = vadd.f32 %v165_v57, %v121_v61  ;;  %v171_v2 = vadd.f32 %v167_v58, %v123_v63 }
 0x102   :  { %v106_v6 = vpop.permute.xlu0 %105  ;;  %v110_v7 = vpop.permute.xlu1 %109 }
 0x103   :  { %v114_v39 = vsel %vm113_vm1, %v106_v6, %v108_v54  ;;  %v115_v40 = vsel %vm113_vm1, %v110_v7, %v112_v55 }
 0x104   :  { %v120_v10 = vadd.f32 %v114_v39, %v89_v5  ;;  %v122_v11 = vadd.f32 %v115_v40, %v91_v4 }
 0x106   :  { %v187_v28 = vpop.permute.xlu0 %186  ;;  %v191_v13 = vpop.permute.xlu1 %190  ;;  %v168_v29 = vadd.f32 %v164_v8, %v120_v10  ;;  %v170_v15 = vadd.f32 %v166_v9, %v122_v11 }
 0x107   :  { %v199_v17 = vadd.f32 %v187_v28, %v169_v1  ;;  %v201_v33 = vadd.f32 %v191_v13, %v171_v2 }
 0x10a   :  { %v185_v19 = vpop.permute.xlu0 %184  ;;  %v189_v20 = vpop.permute.xlu1 %188 }
 0x10b   :  { %v192_v14 = vsel %vm82_vm0, %v185_v19, %v187_v28  ;;  %v193_v38 = vsel %vm82_vm0, %v189_v20, %v191_v13 }
 0x10c   :  { %v198_v24 = vadd.f32 %v192_v14, %v168_v29  ;;  %v200_v46 = vadd.f32 %v193_v38, %v170_v15 }
 0x10e   :  { %v215_v25 = vpop.permute.xlu0 %214  ;;  %v217_v27 = vpop.permute.xlu1 %216 }
 0x10f   :  { %v222_v30 = vsel %vm113_vm1, %v215_v25, %v217_v27  ;;  %v229_v31 = vadd.f32 %v217_v27, %v199_v17 }
 0x110   :  { %v228_v32 = vadd.f32 %v222_v30, %v198_v24 }
 0x111   :  { %v277_v35 = vadd.f32 %v273_v49, %v229_v31 }
 0x112   :  { %v295_v36 = vpop.permute.xlu0 %294  ;;  %v221_v16 = vpop.permute.xlu1 %220  ;;  %v276_v37 = vadd.f32 %v272_v50, %v228_v32 }
 0x113   :  { %v231_v41 = vadd.f32 %v221_v16, %v201_v33  ;;  %v307_v52 = vadd.f32 %v295_v36, %v277_v35 }
 0x115   :  { %v279_v45 = vadd.f32 %v275_v44, %v231_v41 }
 0x116   :  { %v293_v47 = vpop.permute.xlu0 %292  ;;  %v219_v48 = vpop.permute.xlu1 %218 }
 0x117   :  { %v223_v56 = vsel %vm113_vm1, %v219_v48, %v221_v16  ;;  %v300_v57 = vsel %vm82_vm0, %v293_v47, %v295_v36 }
 0x118   :  { %v230_v51 = vadd.f32 %v223_v56, %v200_v46  ;;  %v306_v60 = vadd.f32 %v300_v57, %v276_v37 }
 0x11a   :  { %v325_v53 = vpop.permute.xlu0 %324  ;;  %v299_v54 = vpop.permute.xlu1 %298  ;;  %v278_v55 = vadd.f32 %v274_v62, %v230_v51 }
 0x11b   :  { %v337_v58 = vadd.f32 %v325_v53, %v307_v52  ;;  %v309_v22 = vadd.f32 %v299_v54, %v279_v45 }
 0x11d   :  { %v385_v59 = vadd.f32 %v381_v3, %v337_v58  ;;  %v643_v3 = vmov 12  }
 0x11e   :  { %v323_v61 = vpop.permute.xlu0 %322  ;;  %v297_v63 = vpop.permute.xlu1 %296  ;;  %596 = vset.pattern.permute.xlu0 %v643_v3 }
 0x11f   :  { %v330_v21 = vsel %vm113_vm1, %v323_v61, %v325_v53  ;;  %v301_v5 = vsel %vm82_vm0, %v297_v63, %v299_v54 }
 0x120   :  { %v336_v42 = vadd.f32 %v330_v21, %v306_v60  ;;  %v308_v39 = vadd.f32 %v301_v5, %v278_v55 }
 0x122   :  { %v403_v1 = vpop.permute.xlu0 %402  ;;  %v329_v2 = vpop.permute.xlu1 %328  ;;  %v384_v4 = vadd.f32 %v380_v12, %v336_v42 }
 0x123   :  { %v339_v6 = vadd.f32 %v329_v2, %v309_v22  ;;  %v415_v15 = vadd.f32 %v403_v1, %v385_v59  ;;  %v644_v59 = vmov 13  }
 0x124   :  { %597 = vset.pattern.permute.xlu1 %v644_v59 }
 0x125   :  { %v387_v7 = vadd.f32 %v383_v18, %v339_v6 }
 0x126   :  { %v401_v40 = vpop.permute.xlu0 %400  ;;  %v327_v8 = vpop.permute.xlu1 %326 }
 0x127   :  { %v331_v9 = vsel %vm113_vm1, %v327_v8, %v329_v2  ;;  %v408_v26 = vsel %vm82_vm0, %v401_v40, %v403_v1 }
 0x128   :  { %v338_v10 = vadd.f32 %v331_v9, %v308_v39  ;;  %v414_v34 = vadd.f32 %v408_v26, %v384_v4 }
 0x12a   :  { %v407_v11 = vpop.permute.xlu1 %406  ;;  %v386_v28 = vadd.f32 %v382_v23, %v338_v10  ;;  %v433_v13 = vpop.permute.xlu0 %432 }
 0x12b   :  { %v417_v19 = vadd.f32 %v407_v11, %v387_v7  ;;  %v445_v20 = vadd.f32 %v433_v13, %v415_v15 }
 0x12d   :  { %v449_v43 = vsel %vm113_vm1, %v445_v20, 0.0 }
 0x12e   :  { %v405_v29 = vpop.permute.xlu1 %404  ;;  %v431_v14 = vpop.permute.xlu0 %430 }
 0x12f   :  { %v409_v24 = vsel %vm82_vm0, %v405_v29, %v407_v11  ;;  %v438_v27 = vsel %vm113_vm1, %v431_v14, %v433_v13 }
 0x130   :  { %v416_v31 = vadd.f32 %v409_v24, %v386_v28  ;;  %v444_v33 = vadd.f32 %v438_v27, %v414_v34 }
 0x132   :  { %v437_v17 = vpop.permute.xlu1 %436 }
 0x133   :  { %v447_v25 = vadd.f32 %v437_v17, %v417_v19 }
 0x135   :  { %v450_v30 = vsel %vm113_vm1, %v447_v25, 0.0 }
 0x136   :  { %v435_v49 = vpop.permute.xlu1 %434  ;;  %v451_v32 = vadd.f32 %v450_v30, %v449_v43 }
 0x137   :  { %v439_v50 = vsel %vm113_vm1, %v435_v49, %v437_v17 }
 0x138   :  { %v446_v35 = vadd.f32 %v439_v50, %v416_v31  ;;  %v452_v16 = vsel %vm113_vm1, %v451_v32, 0.0 }
 0x13a   :  { %v448_v36 = vadd.f32 %v446_v35, %v444_v33 }
 0x13c   :  { %v453_v37 = vadd.f32 %v452_v16, %v448_v36 }
 0x13e   :  { %454 = vadd.xlane.f32.xlu0 %v453_v37 }
 0x1cb   :  { %v455_v38 = vpop.xlane.xlu0 %454 }
 0x1cc   :  { %v456_v41 = vmul.f32 0.0026041667, %v455_v38 }
 0x1ce   :  { %v458_v44 = vsub.f32 %v445_v20, %v456_v41  ;;  %v460_v45 = vsub.f32 %v447_v25, %v456_v41  ;;  %v457_v46 = vsub.f32 %v444_v33, %v456_v41  ;;  %v459_v47 = vsub.f32 %v446_v35, %v456_v41 }
 0x1d0   :  { %v461_v48 = vmul.f32 %v457_v46, %v457_v46  ;;  %v462_v56 = vmul.f32 %v458_v44, %v458_v44  ;;  %v463_v62 = vmul.f32 %v459_v47, %v459_v47  ;;  %v464_v51 = vmul.f32 %v460_v45, %v460_v45 }
 0x1d2   :  { %v466_v52 = vsel %vm113_vm1, %v462_v56, 0.0  ;;  %v467_v53 = vsel %vm113_vm1, %v464_v51, 0.0  ;;  %v465_v55 = vadd.f32 %v463_v62, %v461_v48 }
 0x1d3   :  { %v468_v54 = vadd.f32 %v467_v53, %v466_v52 }
 0x1d5   :  { %v469_v57 = vsel %vm113_vm1, %v468_v54, 0.0 }
 0x1d6   :  { %v470_v58 = vadd.f32 %v469_v57, %v465_v55 }
 0x1d8   :  { %471 = vadd.xlane.f32.xlu1 %v470_v58 }
 0x1e9   :  { %487 = vperm.xlu1 %597, %v669_v0  }
 0x265   :  { %v472_v60 = vpop.xlane.xlu1 %471 }
 0x266   :  { %v473_v61 = vmul.f32 0.0026041667, %v472_v60 }
 0x268   :  { %v474_v63 = vadd.f32 1e-05, %v473_v61 }
 0x269   :  { %v488_v22 = vpop.permute.xlu1 %487 }
 0x26a   :  { %599 = vrsqrt.f32 %v474_v63 }
 0x274   :  { %v600_v21 = vpop.eup %599 }
 0x275   :  { %v476_v12 = vmul.f32 %v600_v21, %v669_v0 }
 0x277   :  { %479 = vperm.xlu0 %596, %v476_v12  }
 0x27b   :  { %598 = vset.pattern.permute.xlu0 %v644_v59 }
 0x2f6   :  { %v480_v42 = vpop.permute.xlu0 %479 }
 0x2f7   :  { %v482_v1 = vmul.f32 %v480_v42, %v457_v46  ;;  %v483_v2 = vmul.f32 %v480_v42, %v458_v44  ;;  %v484_v5 = vmul.f32 %v480_v42, %v459_v47  ;;  %v485_v18 = vmul.f32 %v480_v42, %v460_v45 }
 0x2f9   :  { %v490_v4 = vadd.f32 %v488_v22, %v482_v1  ;;  %v491_v6 = vadd.f32 %v488_v22, %v483_v2  ;;  %v492_v7 = vadd.f32 %v488_v22, %v484_v5  ;;  %v493_v39 = vadd.f32 %v488_v22, %v485_v18 }
 0x2fb   :  { %498 = vrot.lane.b32.xlu1 %v490_v4, %s645_s15 }
 0x2ff   :  { %500 = vrot.lane.b32.xlu1 %v491_v6, %s645_s15 }
 0x303   :  { %502 = vrot.lane.b32.xlu1 %v492_v7, %s645_s15 }
 0x307   :  { %504 = vrot.lane.b32.xlu1 %v493_v39, %s645_s15 }
 0x36d   :  { %v499_v40 = vpop.permute.xlu1 %498 }
 0x371   :  { %v501_v0 = vpop.permute.xlu1 %500 }
 0x372   :  { %v507_v8 = vsel %vm506_vm2, %v499_v40, %v501_v0 }
 0x373   :  { %v511_v9 = vmax.f32 %v490_v4, %v507_v8 }
 0x375   :  { %515 = vrot.lane.b32.xlu1 %v511_v9, %s646_s16  ;;  %v503_v23 = vpop.permute.xlu1 %502 }
 0x379   :  { %v505_v10 = vpop.permute.xlu1 %504 }
 0x37a   :  { %v508_v11 = vsel %vm506_vm2, %v503_v23, %v505_v10 }
 0x37b   :  { %v512_v28 = vmax.f32 %v492_v7, %v508_v11 }
 0x37d   :  { %517 = vrot.lane.b32.xlu1 %v512_v28, %s646_s16 }
 0x3e7   :  { %v516_v13 = vpop.permute.xlu1 %515 }
 0x3e8   :  { %v521_v29 = vmax.f32 %v511_v9, %v516_v13 }
 0x3ea   :  { %525 = vrot.lane.b32.xlu0 %v521_v29, %s647_s17 }
 0x3ee   :  { %533 = vrot.lane.b32.xlu0 %v521_v29, %s641_s0 }
 0x3ef   :  { %v518_v15 = vpop.permute.xlu1 %517 }
 0x3f0   :  { %v522_v19 = vmax.f32 %v512_v28, %v518_v15 }
 0x3f2   :  { %527 = vrot.lane.b32.xlu1 %v522_v19, %s647_s17 }
 0x3f6   :  { %535 = vrot.lane.b32.xlu1 %v522_v19, %s641_s0 }
 0x45c   :  { %v526_v20 = vpop.permute.xlu0 %525 }
 0x45d   :  { %v531_v14 = vmax.f32 %v521_v29, %v526_v20 }
 0x460   :  { %v534_v17 = vpop.permute.xlu0 %533 }
 0x461   :  { %v539_v26 = vmax.f32 %v531_v14, %v534_v17 }
 0x463   :  { %601 = vtanh.f32 %v539_v26 }
 0x464   :  { %v528_v24 = vpop.permute.xlu1 %527 }
 0x465   :  { %v532_v25 = vmax.f32 %v522_v19, %v528_v24 }
 0x468   :  { %v536_v27 = vpop.permute.xlu1 %535 }
 0x469   :  { %v540_v30 = vmax.f32 %v532_v25, %v536_v27 }
 0x46b   :  { %603 = vtanh.f32 %v540_v30 }
 0x46d   :  { %v602_v34 = vpop.eup %601 }
 0x46e   :  { %544 = vst.msk [vmem:[#allocation2] sm:$0xff] %vm543_vm3, %v602_v34 }
 0x475   :  { %v604_v43 = vpop.eup %603 }
 0x476   :  { %545 = vst.msk [vmem:[#allocation2 + $0x8] sm:$0xff] %vm543_vm3, %v604_v43 }
 0x477   :  { %616 = shalt.err (!%p613_p4)
}
 0x478   :  { %s617_s23 = scalar_lea.hbm %s883_s2, 256 }
 0x479   :  { %p618_p5 = scmp.ne.s32.totalorder %s883_s2, %s617_s23  ;;  %p621_p6 = scmp.lt.u32.totalorder %s617_s23, %s883_s2 }
 0x47b   :  { %p623_p7 = pnand %p621_p6, %p618_p5 }
 0x47d   :  { %626 = shalt.err (!%p623_p7)
}
 0x47e   :  { %s649_s28 = smov 128   ;;  %s650_s29 = smov 8  }
 0x47f   :  { %557 = dma.vmem_to_hbm [thread:$0]  %s552_s19, 256, %s883_s2, [#allocation3], %s649_s28, %s649_s28, %s650_s29  }
 0x480   :  { %627 = dma.done.wait [#allocation3], 256  }
 0x481   :  { %628 = vsyncadd [#allocation3], 4294967040 }
 0x482   :  { %561 = vsyncpa [#allocation3], 1 }

</bundles_post_ra>
